<compile_context>
chip_gen: v5e
topology: v5e:2x2
jax: 0.10.0
libtpu: 0.0.40
codegen_flags: <defaults>
</compile_context>

<pallas_src>
import functools

import jax
import jax.numpy as jnp
from jax.experimental import pallas as pl
from jax.experimental.pallas import tpu as pltpu


_PASS1_TILE_ELEMS = 1 << 20   # ~4 MiB f32 per buffer (input-only stream)
_PASS2_TILE_ELEMS = 1 << 19   # ~2 MiB f32 per buffer (input + output streams)


def _round_up(a, m):
    return ((a + m - 1) // m) * m


def _minmax_partial_kernel(x_ref, part_ref, *, tile_rows, lane, total, need_mask):
    """Per-tile partial min/max, row-axis reduce only (stays on the VPU).

    Writes min into part_ref[0, 0] and max into part_ref[0, 1], each (8, lane).
    Out-of-range rows / lanes of a partial last tile are masked with +/-inf.
    Grid steps are independent ("parallel") -> shards across TCs on v7x.
    """
    # Upcast once so the (tile_rows//8, 8, lane) regrouping stays aligned with
    # the native f32 (8,128) tiling regardless of the input packing; the VPU
    # has ample slack in this HBM-bound pass.
    xf = x_ref[...].astype(jnp.float32)

    if need_mask:
        row0 = pl.program_id(0) * tile_rows
        r = jax.lax.broadcasted_iota(jnp.int32, (tile_rows, lane), 0) + row0
        full_rows, rem = divmod(total, lane)
        if rem == 0:
            valid = r < full_rows
        else:
            c = jax.lax.broadcasted_iota(jnp.int32, (tile_rows, lane), 1)
            valid = (r < full_rows) | ((r == full_rows) & (c < rem))
        x_min = jnp.where(valid, xf, jnp.inf)
        x_max = jnp.where(valid, xf, -jnp.inf)
    else:
        x_min = xf
        x_max = xf

    g = tile_rows // 8
    part_ref[0, 0] = jnp.min(x_min.reshape(g, 8, lane), axis=0)
    part_ref[0, 1] = jnp.max(x_max.reshape(g, 8, lane), axis=0)


def _rescale_kernel(params_ref, x_ref, o_ref):
    """Fused multiply-add: o = x * scale + offset (scalars from SMEM)."""
    scale = params_ref[0]
    offset = params_ref[1]
    o_ref[...] = (x_ref[...].astype(jnp.float32) * scale + offset).astype(o_ref.dtype)


def change_im_range_pallas(x, new_min, new_max):
    """Pallas equivalent of the PyTorch change_im_range helper.

    Values are affinely remapped so global min -> new_min, global max -> new_max.
    """
    orig_shape = x.shape
    orig_dtype = x.dtype
    out_dtype = orig_dtype if jnp.issubdtype(orig_dtype, jnp.floating) else jnp.float32

    total = x.size
    x_flat = x.reshape(-1)

    # Largest lane-dense minor dim (multiple of 128) that divides the element
    # count -> pure reshape, no padding copy and no output slice.
    lane = None
    for cand in (512, 256, 128):
        if total % cand == 0:
            lane = cand
            break
    needs_slice = False
    if lane is None:
        # TODO(synk): element counts not divisible by 128 need one pad copy and
        # a trailing slice; the in-kernel mask keeps min/max correct.
        lane = 128
        padded = _round_up(total, lane)
        x_flat = jnp.pad(x_flat, (0, padded - total))
        needs_slice = True

    rows = x_flat.size // lane
    x2 = x_flat.reshape(rows, lane)

    # Sublane rounding for packed dtypes: 8 (32-bit), 16 (bf16), 32 (int8/fp8).
    sub = 8 * max(1, 4 // max(1, x.dtype.itemsize))

    # Pass-1 tiles (input-only): bigger; pass-2 tiles (in+out): smaller.
    # Target >= 2 tiles per pass so both v7x TensorCores stream concurrently.
    max_rows1 = max(sub, _PASS1_TILE_ELEMS // lane)
    tr1 = min(max_rows1, _round_up(pl.cdiv(rows, 2), sub))
    nt1 = pl.cdiv(rows, tr1)

    max_rows2 = max(sub, _PASS2_TILE_ELEMS // lane)
    tr2 = min(max_rows2, _round_up(pl.cdiv(rows, 2), sub))
    nt2 = pl.cdiv(rows, tr2)

    # Mask only when the last pass-1 tile is partial or a lane remainder exists.
    need_mask = (rows % tr1 != 0) or (total % lane != 0)

    # ---- Pass 1: per-tile partial min/max (parallel grid) ----
    kernel1 = functools.partial(
        _minmax_partial_kernel,
        tile_rows=tr1, lane=lane, total=total, need_mask=need_mask)
    parts = pl.pallas_call(
        kernel1,
        out_shape=jax.ShapeDtypeStruct((nt1, 2, 8, lane), jnp.float32),
        grid=(nt1,),
        in_specs=[pl.BlockSpec((tr1, lane), lambda i: (i, 0))],
        out_specs=pl.BlockSpec((1, 2, 8, lane), lambda i: (i, 0, 0, 0)),
        compiler_params=pltpu.CompilerParams(dimension_semantics=("parallel",)),
    )(x2)

    old_min = jnp.min(parts[:, 0])
    old_max = jnp.max(parts[:, 1])
    # TODO(synk): a constant image (old_max == old_min) yields inf/nan scale,
    # matching the PyTorch helper's behavior; no epsilon guard added.
    scale = (jnp.float32(new_max) - jnp.float32(new_min)) / (old_max - old_min)
    offset = jnp.float32(new_min) - old_min * scale
    params = jnp.stack([scale, offset]).astype(jnp.float32)

    # ---- Pass 2: elementwise affine remap (parallel grid) ----
    # Partial last block is safe: out-of-bounds reads are discarded by the
    # out-of-bounds-write drop on the output side.
    out2 = pl.pallas_call(
        _rescale_kernel,
        out_shape=jax.ShapeDtypeStruct((rows, lane), out_dtype),
        grid=(nt2,),
        in_specs=[
            pl.BlockSpec(memory_space=pltpu.SMEM),            # (2,) scale/offset
            pl.BlockSpec((tr2, lane), lambda i: (i, 0)),
        ],
        out_specs=pl.BlockSpec((tr2, lane), lambda i: (i, 0)),
        compiler_params=pltpu.CompilerParams(dimension_semantics=("parallel",)),
    )(params, x2)

    out = out2.reshape(-1)
    if needs_slice:
        out = out[:total]
    return out.reshape(orig_shape)


@jax.jit
def invnet_forward(x):
    """Concrete forward for this synthetic InvNet: rescale input into [0, 1]."""
    return change_im_range_pallas(x, new_min=0.0, new_max=1.0)


if __name__ == "__main__":
    key = jax.random.PRNGKey(0)
    # Small NCHW batch: batch=2, channels=4, spatial=16x16.
    x = jax.random.normal(key, (2, 4, 16, 16), dtype=jnp.float32) * 3.0 + 1.5

    out = jax.block_until_ready(invnet_forward(x))

    # Pure-JAX reference for change_im_range(x, 0.0, 1.0).
    old_min = jnp.min(x)
    old_max = jnp.max(x)
    ref = (x - old_min) * ((1.0 - 0.0) / (old_max - old_min)) + 0.0

    assert out.shape == x.shape and out.dtype == jnp.float32
    assert jnp.allclose(out, ref, atol=1e-5, rtol=1e-5)
    print("KERNEL_OK")
</pallas_src>

<mosaic_0001>
module attributes {stable_mosaic.version = 11 : i64} {
  func.func @_minmax_partial_kernel(%arg0: i32, %arg1: memref<8x512xf32, #tpu.memory_space<vmem>>, %arg2: memref<1x2x8x512xf32, #tpu.memory_space<vmem>>) attributes {dimension_semantics = [#tpu.dimension_semantics<parallel>], iteration_bounds = array<i64: 1>, scalar_prefetch = 0 : i64, scratch_operands = 0 : i64, tpu.core_type = #tpu.core_type<tc>, window_params = [{transform_indices = @transform_0, window_bounds = array<i64: 8, 512>}, {transform_indices = @transform_1, window_bounds = array<i64: 1, 2, 8, 512>}]} {
    %c0 = arith.constant 0 : index
    %c0_0 = arith.constant 0 : index
    %0 = vector.load %arg1[%c0, %c0_0] : memref<8x512xf32, #tpu.memory_space<vmem>>, vector<8x512xf32>
    %c8_i32 = arith.constant 8 : i32
    %1 = arith.muli %arg0, %c8_i32 : i32
    %2 = tpu.iota {dimensions = array<i32: 0>} : vector<8x512xi32>
    %3 = vector.broadcast %1 : i32 to vector<8x512xi32>
    %4 = arith.addi %2, %3 : vector<8x512xi32>
    %c4_i32 = arith.constant 4 : i32
    %5 = vector.broadcast %c4_i32 : i32 to vector<8x512xi32>
    %6 = arith.cmpi slt, %4, %5 : vector<8x512xi32>
    %cst = arith.constant 0x7F800000 : f32
    %7 = vector.broadcast %cst : f32 to vector<8x512xf32>
    %8 = arith.select %6, %0, %7 : vector<8x512xi1>, vector<8x512xf32>
    %cst_1 = arith.constant 0xFF800000 : f32
    %9 = vector.broadcast %cst_1 : f32 to vector<8x512xf32>
    %10 = arith.select %6, %0, %9 : vector<8x512xi1>, vector<8x512xf32>
    %11 = vector.shape_cast %8 : vector<8x512xf32> to vector<1x8x512xf32>
    %cst_2 = arith.constant dense<0x7F800000> : vector<8x512xf32>
    %12 = vector.multi_reduction <minimumf>, %11, %cst_2 [0] : vector<1x8x512xf32> to vector<8x512xf32>
    %c0_3 = arith.constant 0 : index
    %c0_4 = arith.constant 0 : index
    %c0_5 = arith.constant 0 : index
    %c0_6 = arith.constant 0 : index
    %13 = vector.load %arg2[%c0_3, %c0_4, %c0_5, %c0_6] : memref<1x2x8x512xf32, #tpu.memory_space<vmem>>, vector<1x1x8x512xf32>
    %14 = vector.shape_cast %13 : vector<1x1x8x512xf32> to vector<8x512xf32>
    %15 = vector.shape_cast %12 : vector<8x512xf32> to vector<1x1x8x512xf32>
    tpu.vector_store %arg2[%c0_3, %c0_4, %c0_5, %c0_6], %15 {strides = array<i32>} : memref<1x2x8x512xf32, #tpu.memory_space<vmem>>, vector<1x1x8x512xf32>,
    %16 = vector.shape_cast %10 : vector<8x512xf32> to vector<1x8x512xf32>
    %cst_7 = arith.constant dense<0xFF800000> : vector<8x512xf32>
    %17 = vector.multi_reduction <maximumf>, %16, %cst_7 [0] : vector<1x8x512xf32> to vector<8x512xf32>
    %c0_8 = arith.constant 0 : index
    %c1 = arith.constant 1 : index
    %c0_9 = arith.constant 0 : index
    %c0_10 = arith.constant 0 : index
    %18 = vector.load %arg2[%c0_8, %c1, %c0_9, %c0_10] : memref<1x2x8x512xf32, #tpu.memory_space<vmem>>, vector<1x1x8x512xf32>
    %19 = vector.shape_cast %18 : vector<1x1x8x512xf32> to vector<8x512xf32>
    %20 = vector.shape_cast %17 : vector<8x512xf32> to vector<1x1x8x512xf32>
    tpu.vector_store %arg2[%c0_8, %c1, %c0_9, %c0_10], %20 {strides = array<i32>} : memref<1x2x8x512xf32, #tpu.memory_space<vmem>>, vector<1x1x8x512xf32>,
    return
  }
  func.func @transform_0(%arg0: i32) -> (i32, i32) {
    %c0_i32 = arith.constant 0 : i32
    %c0_i32_0 = arith.constant 0 : i32
    return %arg0, %c0_i32 : i32, i32
  }
  func.func @transform_1(%arg0: i32) -> (i32, i32, i32, i32) {
    %c0_i32 = arith.constant 0 : i32
    %c0_i32_0 = arith.constant 0 : i32
    %c0_i32_1 = arith.constant 0 : i32
    %c0_i32_2 = arith.constant 0 : i32
    return %arg0, %c0_i32, %c0_i32_0, %c0_i32_1 : i32, i32, i32, i32
  }
}

module attributes {stable_mosaic.version = 11 : i64} {
  func.func @_rescale_kernel(%arg0: i32, %arg1: memref<2xf32, #tpu.memory_space<smem>>, %arg2: memref<8x512xf32, #tpu.memory_space<vmem>>, %arg3: memref<8x512xf32, #tpu.memory_space<vmem>>) attributes {dimension_semantics = [#tpu.dimension_semantics<parallel>], iteration_bounds = array<i64: 1>, scalar_prefetch = 0 : i64, scratch_operands = 0 : i64, tpu.core_type = #tpu.core_type<tc>, window_params = [{transform_indices = @transform_0, window_bounds = array<i64: 2>}, {transform_indices = @transform_1, window_bounds = array<i64: 8, 512>}, {transform_indices = @transform_2, window_bounds = array<i64: 8, 512>}]} {
    %c0 = arith.constant 0 : index
    %0 = memref.load %arg1[%c0] : memref<2xf32, #tpu.memory_space<smem>>
    %c1 = arith.constant 1 : index
    %1 = memref.load %arg1[%c1] : memref<2xf32, #tpu.memory_space<smem>>
    %c0_0 = arith.constant 0 : index
    %c0_1 = arith.constant 0 : index
    %2 = vector.load %arg2[%c0_0, %c0_1] : memref<8x512xf32, #tpu.memory_space<vmem>>, vector<8x512xf32>
    %3 = vector.broadcast %0 : f32 to vector<8x512xf32>
    %4 = arith.mulf %2, %3 : vector<8x512xf32>
    %5 = vector.broadcast %1 : f32 to vector<8x512xf32>
    %6 = arith.addf %4, %5 : vector<8x512xf32>
    %c0_2 = arith.constant 0 : index
    %c0_3 = arith.constant 0 : index
    %7 = vector.load %arg3[%c0_2, %c0_3] : memref<8x512xf32, #tpu.memory_space<vmem>>, vector<8x512xf32>
    tpu.vector_store %arg3[%c0_2, %c0_3], %6 {strides = array<i32>} : memref<8x512xf32, #tpu.memory_space<vmem>>, vector<8x512xf32>,
    return
  }
  func.func @transform_0(%arg0: i32) -> i32 {
    %c0_i32 = arith.constant 0 : i32
    %c0_i32_0 = arith.constant 0 : i32
    return %c0_i32 : i32
  }
  func.func @transform_1(%arg0: i32) -> (i32, i32) {
    %c0_i32 = arith.constant 0 : i32
    %c0_i32_0 = arith.constant 0 : i32
    return %arg0, %c0_i32 : i32, i32
  }
  func.func @transform_2(%arg0: i32) -> (i32, i32) {
    %c0_i32 = arith.constant 0 : i32
    %c0_i32_0 = arith.constant 0 : i32
    return %arg0, %c0_i32 : i32, i32
  }
}

</mosaic_0001>

<bundles_post_ra>
// kernel: invnet_forward.2
= control target key start
LH: loop header
LB: loop body
LE: loop exit
PB: predicated region body
PF: predicated region fallthrough
CT: control target
= control target key end

     0   :  { %v13_v0 = vlaneseq  ;;  %s131_s0 = inlined_call_operand.vmem [shape: f32[4,512], index: 0, kind: input, shape index: {}]   ;;  %s132_s1 = inlined_call_operand.vmem [shape: f32[1,2,8,512], index: 1, kind: output, shape index: {}]  }
   0x1   :  { %v8_v1 = vld [vmem:[%s131_s0] sm:$0xff]  ;;  %v10_v2 = vld [vmem:[%s131_s0 + $0x10] sm:$0xff]  ;;  %v9_v3 = vld [vmem:[%s131_s0 + $0x8] sm:$0xff] }
   0x2   :  { %22 = vst [vmem:[#allocation1] ss:$2 sm:$0xff] %v8_v1  ;;  %v11_v4 = vld [vmem:[%s131_s0 + $0x18] sm:$0xff]  ;;  %v14_v5 = vshrl.u32 %v13_v0, 7 }
   0x3   :  { %24 = vst [vmem:[#allocation1 + $0x1] ss:$2 sm:$0xff] %v10_v2 }
   0x4   :  { %26 = vst [vmem:[#allocation1 + $0x10] ss:$2 sm:$0xff] %v9_v3  ;;  %vm17_vm0 = vcmp.lt.s32.totalorder %v14_v5, 4 }
   0x5   :  { %28 = vst [vmem:[#allocation1 + $0x11] ss:$2 sm:$0xff] %v11_v4 }
   0xa   :  { %v29_v6 = vld.sshfl [vmem:[#allocation1] sm:$0xff pattern:$0x75316420]  ;;  %v30_v7 = vld.sshfl [vmem:[#allocation1 + $0x8] sm:$0xff pattern:$0x75316420] }
   0xb   :  { %41 = vst [vmem:[#allocation1] ss:$2 sm:$0xff] %v8_v1  ;;  %v37_v8 = vsel %vm17_vm0, %v29_v6, inf  ;;  %v38_v11 = vsel %vm17_vm0, %v30_v7, inf }
   0xc   :  { %43 = vst [vmem:[#allocation1 + $0x1] ss:$2 sm:$0xff] %v10_v2  ;;  %v31_v9 = vld.sshfl [vmem:[#allocation1 + $0x10] sm:$0xff pattern:$0x75316420] }
   0xd   :  { %v32_v10 = vld.sshfl [vmem:[#allocation1 + $0x18] sm:$0xff pattern:$0x75316420]  ;;  %60 = vst [vmem:[%s132_s1] sm:$0xff] %v37_v8  ;;  %v39_v12 = vsel %vm17_vm0, %v31_v9, inf }
   0xe   :  { %45 = vst [vmem:[#allocation1 + $0x10] ss:$2 sm:$0xff] %v9_v3  ;;  %v40_v13 = vsel %vm17_vm0, %v32_v10, inf }
   0xf   :  { %47 = vst [vmem:[#allocation1 + $0x11] ss:$2 sm:$0xff] %v11_v4 }
  0x10   :  { %61 = vst [vmem:[%s132_s1 + $0x8] sm:$0xff] %v38_v11 }
  0x11   :  { %62 = vst [vmem:[%s132_s1 + $0x10] sm:$0xff] %v39_v12 }
  0x12   :  { %63 = vst [vmem:[%s132_s1 + $0x18] sm:$0xff] %v40_v13 }
  0x13   :  { %v48_v14 = vld.sshfl [vmem:[#allocation1] sm:$0xff pattern:$0x75316420]  ;;  %v49_v15 = vld.sshfl [vmem:[#allocation1 + $0x8] sm:$0xff pattern:$0x75316420] }
  0x14   :  { %v56_v16 = vsel %vm17_vm0, %v48_v14, -inf  ;;  %v57_v17 = vsel %vm17_vm0, %v49_v15, -inf }
  0x15   :  { %73 = vst [vmem:[%s132_s1 + $0x20] sm:$0xff] %v56_v16 }
  0x16   :  { %74 = vst [vmem:[%s132_s1 + $0x28] sm:$0xff] %v57_v17  ;;  %v50_v18 = vld.sshfl [vmem:[#allocation1 + $0x10] sm:$0xff pattern:$0x75316420] }
  0x17   :  { %v58_v19 = vsel %vm17_vm0, %v50_v18, -inf  ;;  %v51_v20 = vld.sshfl [vmem:[#allocation1 + $0x18] sm:$0xff pattern:$0x75316420] }
  0x18   :  { %75 = vst [vmem:[%s132_s1 + $0x30] sm:$0xff] %v58_v19  ;;  %v59_v21 = vsel %vm17_vm0, %v51_v20, -inf }
  0x19   :  { %76 = vst [vmem:[%s132_s1 + $0x38] sm:$0xff] %v59_v21 }

// kernel: invnet_forward.3
= control target key start
LH: loop header
LB: loop body
LE: loop exit
PB: predicated region body
PF: predicated region fallthrough
CT: control target
= control target key end

     0   :  { %7 = vsyncpa [#allocation3], 0  ;;  %s88_s12 = smov [#allocation2]   ;;  %s119_s0 = inlined_call_operand.vmem [shape: f32[2], index: 0, kind: input, shape index: {}]   ;;  %s120_s1 = inlined_call_operand.vmem [shape: f32[4,512], index: 1, kind: input, shape index: {}]   ;;  %s121_s2 = inlined_call_operand.vmem [shape: f32[4,512], index: 2, kind: output, shape index: {}]  }
   0x1   :  { %s13_s11 = sshll.u32 %s119_s0, 4  ;;  %s14_s11 = int_to_ptr.vmem [resolvable:$true] %s13_s11 }
   0x2   :  { %16 = dma.vmem_to_smem %s14_s11, 16, %s88_s12, [#allocation3]  }
   0x3   :  { %86 = dma.done.wait [#allocation3], 16  }
   0x4   :  { %87 = vsyncadd [#allocation3], 4294967280 }
   0x5   :  { %23 = sfence }
   0x6   :  { %s24_s13 = sld [smem:[#allocation2]]  ;;  %v26_v0 = vld [vmem:[%s120_s1] sm:$0xff]  ;;  %v27_v1 = vld [vmem:[%s120_s1 + $0x8] sm:$0xff] }
   0x7   :  { %s72_s14 = sld [smem:[#allocation2 + $0x1]] }
   0xc   :  { %v30_v2 = vstv %s24_s13 }
   0xd   :  { %v31_v3 = vmul.f32 %v30_v2, %v26_v0  ;;  %v35_v4 = vstv %s72_s14  ;;  %v32_v5 = vmul.f32 %v30_v2, %v27_v1 }
   0xf   :  { %v36_v6 = vadd.f32 %v35_v4, %v31_v3  ;;  %v37_v7 = vadd.f32 %v35_v4, %v32_v5 }
  0x11   :  { %59 = vst [vmem:[%s121_s2] sm:$0xff] %v36_v6 }
  0x12   :  { %61 = vst [vmem:[%s121_s2 + $0x8] sm:$0xff] %v37_v7 }
  0x13   :  { %67 = vsyncpa [#allocation3], 1 }

</bundles_post_ra>
